<compile_context>
chip_gen: v7x
topology: tpu7x:2x2x1
jax: 0.10.0
libtpu: 0.0.40
codegen_flags: <defaults>
</compile_context>

<pallas_src>
import functools

import jax
import jax.numpy as jnp
from jax.experimental import pallas as pl
from jax.experimental.pallas import tpu as pltpu

SQRT_2PI = (2.0 * 3.14159) ** 0.5  # matches the torch.jit.script constant
_LANE = 128


def _gaussian_kernel(xt_ref, mean_ref, nhvar_ref, coeff_ref, o_ref):
    # xt_ref   : (128, C) f32 -- column b holds the 128 positions of chunk b of
    #            this block, one position per sublane row.
    # mean_ref : (1, K) f32   -- resident across the grid.
    # nhvar_ref: (1, K) f32   -- -0.5 / std**2
    # coeff_ref: (1, K) f32   -- 1 / (sqrt(2*pi) * std)
    # o_ref    : (C*128, K) in the output dtype.
    mean = mean_ref[...]
    nhvar = nhvar_ref[...]
    coeff = coeff_ref[...]
    n_chunks = xt_ref.shape[-1]
    for b in range(n_chunks):                       # static unroll (C chunks)
        col = xt_ref[:, b:b + 1]                    # (128, 1)
        d = col - mean                              # (128, K) two-way broadcast
        g = jnp.exp(d * d * nhvar) * coeff          # (128, K) f32
        o_ref[b * _LANE:(b + 1) * _LANE, :] = g.astype(o_ref.dtype)


@functools.partial(jax.jit, static_argnames=("tm",))
def gaussian_layer(x, edge_type, means_w, stds_w, mul_w, bias_w, *, tm=8192):
    """Pallas implementation of GaussianLayer.forward.

    x:         (B, N, N) float
    edge_type: (B, N, N) int32
    means_w:   (1, K), stds_w: (1, K), mul_w: (E, 1), bias_w: (E, 1)
    returns    (B, N, N, K), dtype of means_w
    """
    B, N1, N2 = x.shape
    K = means_w.shape[-1]
    out_dtype = means_w.dtype
    M = B * N1 * N2

    # ---- per-position scalar path (O(M) bytes, dense 1-D arrays only).
    et = edge_type.reshape(-1)
    mul = jnp.take(mul_w[:, 0], et, axis=0).astype(x.dtype)      # (M,)
    bias = jnp.take(bias_w[:, 0], et, axis=0).astype(x.dtype)    # (M,)
    xx = (mul * x.reshape(-1) + bias).astype(jnp.float32)        # (M,)

    # ---- tile geometry: tm = C * 128 positions per grid step.
    tm_eff = min(tm, pl.cdiv(M, _LANE) * _LANE)
    tm_eff = max(_LANE, (tm_eff // _LANE) * _LANE)
    C = tm_eff // _LANE
    G = pl.cdiv(M, tm_eff)
    Mp = G * tm_eff

    # Pre-transpose the (tiny) per-position stream so each position sits on its
    # own sublane row inside the kernel: xt3[g, r, b] = xx[g*tm + b*128 + r].
    xx_p = jnp.pad(xx, (0, Mp - M))
    xt3 = xx_p.reshape(G, C, _LANE).swapaxes(1, 2)               # (G, 128, C)

    # (1, K) parameters: fold abs/eps, the square of the divide and the
    # normalization divide out of the kernel.
    mean = means_w.astype(jnp.float32).reshape(1, K)
    std = jnp.abs(stds_w.astype(jnp.float32).reshape(1, K)) + 1e-5
    nhvar = -0.5 / (std * std)
    coeff = 1.0 / (SQRT_2PI * std)

    out = pl.pallas_call(
        _gaussian_kernel,
        out_shape=jax.ShapeDtypeStruct((M, K), out_dtype),
        grid_spec=pltpu.PrefetchScalarGridSpec(
            num_scalar_prefetch=0,
            grid=(G,),
            in_specs=[
                # per-block chunk-column slab; leading dim squeezed away.
                pl.BlockSpec((None, _LANE, C), lambda i: (i, 0, 0)),
                pl.BlockSpec((1, K), lambda i: (0, 0)),    # mean       (resident)
                pl.BlockSpec((1, K), lambda i: (0, 0)),    # -0.5/std^2 (resident)
                pl.BlockSpec((1, K), lambda i: (0, 0)),    # 1/(a*std)  (resident)
            ],
            out_specs=pl.BlockSpec((tm_eff, K), lambda i: (i, 0)),
        ),
        compiler_params=pltpu.CompilerParams(
            dimension_semantics=("parallel",),
            vmem_limit_bytes=32 * 1024 * 1024),
    )(xt3, mean, nhvar, coeff)

    # .type_as(self.means.weight) already satisfied by out_dtype.
    return out.reshape(B, N1, N2, K)


def _reference(x, edge_type, means_w, stds_w, mul_w, bias_w):
    """Pure-JAX reference mirroring the PyTorch forward (uses true division)."""
    K = means_w.shape[-1]
    mul = jnp.take(mul_w, edge_type, axis=0).astype(x.dtype)    # (B,N,N,1)
    bias = jnp.take(bias_w, edge_type, axis=0).astype(x.dtype)  # (B,N,N,1)
    xx = mul * x[..., None] + bias                               # (B,N,N,1)
    xx = jnp.broadcast_to(xx, xx.shape[:-1] + (K,)).astype(jnp.float32)
    mean = means_w.astype(jnp.float32).reshape(-1)
    std = jnp.abs(stds_w.astype(jnp.float32).reshape(-1)) + 1e-5
    g = jnp.exp(-0.5 * ((xx - mean) / std) ** 2) / (SQRT_2PI * std)
    return g.astype(means_w.dtype)


if __name__ == "__main__":
    K = 128
    edge_types = 1024
    B, N = 2, 8

    key = jax.random.PRNGKey(0)
    k_means, k_stds, k_x, k_e = jax.random.split(key, 4)

    # Deterministic parameter init matching nn.init in __init__:
    means_w = jax.random.uniform(k_means, (1, K), jnp.float32, 0.0, 3.0)
    stds_w = jax.random.uniform(k_stds, (1, K), jnp.float32, 0.0, 3.0)
    mul_w = jnp.ones((edge_types, 1), jnp.float32)    # constant_(1)
    bias_w = jnp.zeros((edge_types, 1), jnp.float32)  # constant_(0)

    x = jax.random.uniform(k_x, (B, N, N), jnp.float32, 0.0, 5.0)
    edge_type = jax.random.randint(k_e, (B, N, N), 0, edge_types, jnp.int32)

    out = gaussian_layer(x, edge_type, means_w, stds_w, mul_w, bias_w)
    out = jax.block_until_ready(out)

    ref = _reference(x, edge_type, means_w, stds_w, mul_w, bias_w)
    assert out.shape == (B, N, N, K), out.shape
    assert out.dtype == means_w.dtype, out.dtype
    assert jnp.allclose(out, ref, atol=2e-5, rtol=2e-5), float(
        jnp.max(jnp.abs(out - ref)))

    print("KERNEL_OK")
</pallas_src>

<mosaic_0001>
module attributes {stable_mosaic.version = 11 : i64} {
  func.func @_gaussian_kernel(%arg0: i32, %arg1: memref<1x128x1xf32, #tpu.memory_space<vmem>>, %arg2: memref<1x128xf32, #tpu.memory_space<vmem>>, %arg3: memref<1x128xf32, #tpu.memory_space<vmem>>, %arg4: memref<1x128xf32, #tpu.memory_space<vmem>>, %arg5: memref<128x128xf32, #tpu.memory_space<vmem>>) attributes {dimension_semantics = [#tpu.dimension_semantics<parallel>], iteration_bounds = array<i64: 1>, scalar_prefetch = 0 : i64, scratch_operands = 0 : i64, tpu.core_type = #tpu.core_type<tc>, window_params = [{transform_indices = @transform_0, window_bounds = array<i64: 1, 128, 1>}, {pipeline_mode = #tpu.pipeline_mode<synchronous>, transform_indices = @transform_1, window_bounds = array<i64: 1, 128>}, {pipeline_mode = #tpu.pipeline_mode<synchronous>, transform_indices = @transform_2, window_bounds = array<i64: 1, 128>}, {pipeline_mode = #tpu.pipeline_mode<synchronous>, transform_indices = @transform_3, window_bounds = array<i64: 1, 128>}, {transform_indices = @transform_4, window_bounds = array<i64: 128, 128>}]} {
    %c0 = arith.constant 0 : index
    %c0_0 = arith.constant 0 : index
    %0 = vector.load %arg2[%c0, %c0_0] : memref<1x128xf32, #tpu.memory_space<vmem>>, vector<1x128xf32>
    %c0_1 = arith.constant 0 : index
    %c0_2 = arith.constant 0 : index
    %1 = vector.load %arg3[%c0_1, %c0_2] : memref<1x128xf32, #tpu.memory_space<vmem>>, vector<1x128xf32>
    %c0_3 = arith.constant 0 : index
    %c0_4 = arith.constant 0 : index
    %2 = vector.load %arg4[%c0_3, %c0_4] : memref<1x128xf32, #tpu.memory_space<vmem>>, vector<1x128xf32>
    %c0_5 = arith.constant 0 : index
    %c0_6 = arith.constant 0 : index
    %c0_7 = arith.constant 0 : index
    %3 = vector.load %arg1[%c0_5, %c0_6, %c0_7] : memref<1x128x1xf32, #tpu.memory_space<vmem>>, vector<1x128x1xf32>
    %4 = vector.shape_cast %3 : vector<1x128x1xf32> to vector<128x1xf32>
    %5 = vector.broadcast %4 : vector<128x1xf32> to vector<128x128xf32>
    %6 = vector.broadcast %0 : vector<1x128xf32> to vector<128x128xf32>
    %7 = arith.subf %5, %6 : vector<128x128xf32>
    %8 = arith.mulf %7, %7 : vector<128x128xf32>
    %9 = vector.broadcast %1 : vector<1x128xf32> to vector<128x128xf32>
    %10 = arith.mulf %8, %9 : vector<128x128xf32>
    %11 = math.exp %10 : vector<128x128xf32>
    %12 = vector.broadcast %2 : vector<1x128xf32> to vector<128x128xf32>
    %13 = arith.mulf %11, %12 : vector<128x128xf32>
    %c0_8 = arith.constant 0 : index
    %c0_9 = arith.constant 0 : index
    %14 = vector.load %arg5[%c0_8, %c0_9] : memref<128x128xf32, #tpu.memory_space<vmem>>, vector<128x128xf32>
    tpu.vector_store %arg5[%c0_8, %c0_9], %13 {strides = array<i32>} : memref<128x128xf32, #tpu.memory_space<vmem>>, vector<128x128xf32>,
    return
  }
  func.func @transform_0(%arg0: i32) -> (i32, i32, i32) {
    %c0_i32 = arith.constant 0 : i32
    %c0_i32_0 = arith.constant 0 : i32
    %c0_i32_1 = arith.constant 0 : i32
    return %arg0, %c0_i32, %c0_i32_0 : i32, i32, i32
  }
  func.func @transform_1(%arg0: i32) -> (i32, i32) {
    %c0_i32 = arith.constant 0 : i32
    %c0_i32_0 = arith.constant 0 : i32
    %c0_i32_1 = arith.constant 0 : i32
    return %c0_i32, %c0_i32_0 : i32, i32
  }
  func.func @transform_2(%arg0: i32) -> (i32, i32) {
    %c0_i32 = arith.constant 0 : i32
    %c0_i32_0 = arith.constant 0 : i32
    %c0_i32_1 = arith.constant 0 : i32
    return %c0_i32, %c0_i32_0 : i32, i32
  }
  func.func @transform_3(%arg0: i32) -> (i32, i32) {
    %c0_i32 = arith.constant 0 : i32
    %c0_i32_0 = arith.constant 0 : i32
    %c0_i32_1 = arith.constant 0 : i32
    return %c0_i32, %c0_i32_0 : i32, i32
  }
  func.func @transform_4(%arg0: i32) -> (i32, i32) {
    %c0_i32 = arith.constant 0 : i32
    %c0_i32_0 = arith.constant 0 : i32
    return %arg0, %c0_i32 : i32, i32
  }
}

</mosaic_0001>

<bundles_post_ra>
// kernel: gaussian_layer.1
= control target key start
LH: loop header
LB: loop body
LE: loop exit
PB: predicated region body
PF: predicated region fallthrough
CT: control target
= control target key end

     0   :  { %v328_v2 = vmov 0   ;;  %s480_s0 = inlined_call_operand.vmem [shape: f32[1,128,1], index: 0, kind: input, shape index: {}]   ;;  %s481_s1 = inlined_call_operand.vmem [shape: f32[1,128], index: 1, kind: input, shape index: {}]   ;;  %s482_s2 = inlined_call_operand.vmem [shape: f32[1,128], index: 2, kind: input, shape index: {}]   ;;  %s483_s3 = inlined_call_operand.vmem [shape: f32[1,128], index: 3, kind: input, shape index: {}]   ;;  %s484_s4 = inlined_call_operand.hbm [shape: f32[128,128], index: 4, kind: output, shape index: {}]  }
   0x1   :  { %v23_v0 = vld [vmem:[%s480_s0 + $0x10] sm:$0xff]  ;;  %v21_v1 = vld [vmem:[%s480_s0] sm:$0xff]  ;;  %271 = vset.pattern.permute.xlu1 %v328_v2  ;;  %270 = vset.pattern.permute.xlu0 %v328_v2  ;;  %v24_v3 = vld [vmem:[%s480_s0 + $0x18] sm:$0xff] }
   0x2   :  { %49 = vperm.xlu1 %271, %v23_v0   ;;  %39 = vperm.xlu0 %270, %v21_v1   ;;  %v22_v4 = vld [vmem:[%s480_s0 + $0x8] sm:$0xff] }
   0x6   :  { %54 = vperm.xlu1 %271, %v24_v3   ;;  %44 = vperm.xlu0 %270, %v22_v4  }
   0x7   :  { %9 = vsyncpa [#allocation3], 0  ;;  %v26_v5 = vld [vmem:[%s480_s0 + $0x28] sm:$0xff]  ;;  %v25_v6 = vld [vmem:[%s480_s0 + $0x20] sm:$0xff] }
   0x8   :  { %v28_v7 = vld [vmem:[%s480_s0 + $0x38] sm:$0xff]  ;;  %v27_v8 = vld [vmem:[%s480_s0 + $0x30] sm:$0xff]  ;;  %v30_v9 = vld [vmem:[%s480_s0 + $0x48] sm:$0xff] }
   0x9   :  { %v29_v10 = vld [vmem:[%s480_s0 + $0x40] sm:$0xff]  ;;  %v32_v11 = vld [vmem:[%s480_s0 + $0x58] sm:$0xff]  ;;  %v31_v12 = vld [vmem:[%s480_s0 + $0x50] sm:$0xff] }
   0xa   :  { %64 = vperm.xlu1 %271, %v26_v5   ;;  %59 = vperm.xlu0 %270, %v25_v6   ;;  %v34_v13 = vld [vmem:[%s480_s0 + $0x68] sm:$0xff]  ;;  %v33_v14 = vld [vmem:[%s480_s0 + $0x60] sm:$0xff]  ;;  %v36_v15 = vld [vmem:[%s480_s0 + $0x78] sm:$0xff] }
   0xb   :  { %v35_v16 = vld [vmem:[%s480_s0 + $0x70] sm:$0xff]  ;;  %v408_v17 = vld [vmem:[%s481_s1] ss:$0 sm:$0xff] }
   0xc   :  { %v415_v22 = vld [vmem:[%s482_s2] ss:$0 sm:$0xff]  ;;  %s329_s2 = smov [#allocation2]  }
   0xd   :  { %v432_v57 = vld [vmem:[%s483_s3] ss:$0 sm:$0xff]  ;;  %s252_s3 = sshll.u32 %s329_s2, 4  ;;  %s253_s3 = int_to_ptr.vmem [resolvable:$true] %s252_s3 }
   0xe   :  { %74 = vperm.xlu1 %271, %v28_v7   ;;  %69 = vperm.xlu0 %270, %v27_v8   ;;  %s304_s25 = scalar_lea.vmem %s253_s3, 2048  ;;  %p309_p1 = scmp.lt.s32.totalorder %s253_s3, %s253_s3 }
   0xf   :  { %p305_p0 = scmp.ne.s32.totalorder %s253_s3, %s304_s25  ;;  %p310_p2 = scmp.lt.s32.totalorder %s304_s25, %s304_s25 }
  0x11   :  { %p311_p3 = por %p310_p2, %p309_p1 }
  0x12   :  { %84 = vperm.xlu1 %271, %v30_v9   ;;  %79 = vperm.xlu0 %270, %v29_v10  }
  0x13   :  { %p312_p4 = pnand %p311_p3, %p305_p0 }
  0x16   :  { %94 = vperm.xlu1 %271, %v32_v11   ;;  %89 = vperm.xlu0 %270, %v31_v12  }
  0x1a   :  { %104 = vperm.xlu1 %271, %v34_v13   ;;  %99 = vperm.xlu0 %270, %v33_v14  }
  0x1e   :  { %114 = vperm.xlu1 %271, %v36_v15   ;;  %109 = vperm.xlu0 %270, %v35_v16  }
  0x81   :  { %v50_v18 = vpop.permute.xlu1 %49  ;;  %v40_v19 = vpop.permute.xlu0 %39 }
  0x82   :  { %v125_v20 = vsub.f32 %v50_v18, %v408_v17  ;;  %v123_v21 = vsub.f32 %v40_v19, %v408_v17 }
  0x84   :  { %v141_v23 = vmul.f32 %v125_v20, %v125_v20  ;;  %v139_v24 = vmul.f32 %v123_v21, %v123_v21 }
  0x85   :  { %v55_v25 = vpop.permute.xlu1 %54  ;;  %v45_v26 = vpop.permute.xlu0 %44 }
  0x86   :  { %v163_v27 = vmul.f32 %v415_v22, %v141_v23  ;;  %v161_v28 = vmul.f32 %v415_v22, %v139_v24  ;;  %v126_v29 = vsub.f32 %v55_v25, %v408_v17  ;;  %v124_v30 = vsub.f32 %v45_v26, %v408_v17 }
  0x88   :  { %v181_v31 = vmul.f32 1.442695, %v163_v27  ;;  %v177_v32 = vmul.f32 1.442695, %v161_v28  ;;  %v142_v33 = vmul.f32 %v126_v29, %v126_v29  ;;  %v140_v34 = vmul.f32 %v124_v30, %v124_v30 }
  0x89   :  { %v65_v35 = vpop.permute.xlu1 %64  ;;  %v60_v36 = vpop.permute.xlu0 %59 }
  0x8a   :  { %272 = vpow2.f32 %v181_v31  ;;  %v164_v37 = vmul.f32 %v415_v22, %v142_v33  ;;  %v162_v38 = vmul.f32 %v415_v22, %v140_v34  ;;  %v128_v39 = vsub.f32 %v65_v35, %v408_v17 }
  0x8b   :  { %274 = vpow2.f32 %v177_v32  ;;  %v127_v40 = vsub.f32 %v60_v36, %v408_v17 }
  0x8c   :  { %v183_v41 = vmul.f32 1.442695, %v164_v37  ;;  %v179_v42 = vmul.f32 1.442695, %v162_v38  ;;  %v144_v43 = vmul.f32 %v128_v39, %v128_v39 }
  0x8d   :  { %v143_v44 = vmul.f32 %v127_v40, %v127_v40  ;;  %v75_v45 = vpop.permute.xlu1 %74  ;;  %v70_v46 = vpop.permute.xlu0 %69 }
  0x8e   :  { %276 = vpow2.f32 %v183_v41  ;;  %v166_v47 = vmul.f32 %v415_v22, %v144_v43  ;;  %v130_v48 = vsub.f32 %v75_v45, %v408_v17  ;;  %v129_v49 = vsub.f32 %v70_v46, %v408_v17 }
  0x8f   :  { %278 = vpow2.f32 %v179_v42  ;;  %v165_v50 = vmul.f32 %v415_v22, %v143_v44 }
  0x90   :  { %v187_v51 = vmul.f32 1.442695, %v166_v47  ;;  %v146_v52 = vmul.f32 %v130_v48, %v130_v48  ;;  %v145_v53 = vmul.f32 %v129_v49, %v129_v49 }
  0x91   :  { %v185_v54 = vmul.f32 1.442695, %v165_v50  ;;  %v85_v55 = vpop.permute.xlu1 %84  ;;  %v80_v56 = vpop.permute.xlu0 %79 }
  0x92   :  { %280 = vpow2.f32 %v187_v51  ;;  %v168_v58 = vmul.f32 %v415_v22, %v146_v52  ;;  %v167_v59 = vmul.f32 %v415_v22, %v145_v53  ;;  %v132_v60 = vsub.f32 %v85_v55, %v408_v17 }
  0x93   :  { %282 = vpow2.f32 %v185_v54  ;;  %v131_v61 = vsub.f32 %v80_v56, %v408_v17 }
  0x94   :  { %v273_v62 = vpop.eup %272  ;;  %v191_v63 = vmul.f32 1.442695, %v168_v58  ;;  %v189_v0 = vmul.f32 1.442695, %v167_v59  ;;  %v148_v1 = vmul.f32 %v132_v60, %v132_v60 }
  0x95   :  { %v275_v2 = vpop.eup %274  ;;  %v217_v3 = vmul.f32 %v273_v62, %v432_v57  ;;  %v147_v4 = vmul.f32 %v131_v61, %v131_v61  ;;  %v95_v5 = vpop.permute.xlu1 %94 }
  0x96   :  { %v90_v6 = vpop.permute.xlu0 %89  ;;  %v215_v7 = vmul.f32 %v275_v2, %v432_v57  ;;  %284 = vpow2.f32 %v191_v63  ;;  %v170_v8 = vmul.f32 %v415_v22, %v148_v1  ;;  %v134_v9 = vsub.f32 %v95_v5, %v408_v17 }
  0x97   :  { %233 = vst [vmem:[#allocation2 + $0x10] sm:$0xff] %v217_v3  ;;  %286 = vpow2.f32 %v189_v0  ;;  %v169_v10 = vmul.f32 %v415_v22, %v147_v4  ;;  %v133_v11 = vsub.f32 %v90_v6, %v408_v17 }
  0x98   :  { %v277_v12 = vpop.eup %276  ;;  %231 = vst [vmem:[#allocation2] sm:$0xff] %v215_v7  ;;  %v195_v13 = vmul.f32 1.442695, %v170_v8  ;;  %v150_v14 = vmul.f32 %v134_v9, %v134_v9 }
  0x99   :  { %v279_v15 = vpop.eup %278  ;;  %v218_v16 = vmul.f32 %v277_v12, %v432_v57  ;;  %v193_v18 = vmul.f32 1.442695, %v169_v10  ;;  %v149_v19 = vmul.f32 %v133_v11, %v133_v11  ;;  %v105_v20 = vpop.permute.xlu1 %104 }
  0x9a   :  { %v100_v21 = vpop.permute.xlu0 %99  ;;  %v216_v23 = vmul.f32 %v279_v15, %v432_v57  ;;  %288 = vpow2.f32 %v195_v13  ;;  %v172_v24 = vmul.f32 %v415_v22, %v150_v14  ;;  %v136_v25 = vsub.f32 %v105_v20, %v408_v17 }
  0x9b   :  { %234 = vst [vmem:[#allocation2 + $0x18] sm:$0xff] %v218_v16  ;;  %290 = vpow2.f32 %v193_v18  ;;  %v171_v26 = vmul.f32 %v415_v22, %v149_v19  ;;  %v135_v27 = vsub.f32 %v100_v21, %v408_v17 }
  0x9c   :  { %v281_v28 = vpop.eup %280  ;;  %232 = vst [vmem:[#allocation2 + $0x8] sm:$0xff] %v216_v23  ;;  %v199_v29 = vmul.f32 1.442695, %v172_v24  ;;  %v152_v30 = vmul.f32 %v136_v25, %v136_v25 }
  0x9d   :  { %v283_v31 = vpop.eup %282  ;;  %v220_v32 = vmul.f32 %v281_v28, %v432_v57  ;;  %v197_v33 = vmul.f32 1.442695, %v171_v26  ;;  %v151_v34 = vmul.f32 %v135_v27, %v135_v27  ;;  %v115_v35 = vpop.permute.xlu1 %114 }
  0x9e   :  { %v110_v36 = vpop.permute.xlu0 %109  ;;  %v219_v37 = vmul.f32 %v283_v31, %v432_v57  ;;  %292 = vpow2.f32 %v199_v29  ;;  %v174_v38 = vmul.f32 %v415_v22, %v152_v30  ;;  %v138_v39 = vsub.f32 %v115_v35, %v408_v17 }
  0x9f   :  { %236 = vst [vmem:[#allocation2 + $0x28] sm:$0xff] %v220_v32  ;;  %294 = vpow2.f32 %v197_v33  ;;  %v173_v40 = vmul.f32 %v415_v22, %v151_v34  ;;  %v137_v41 = vsub.f32 %v110_v36, %v408_v17 }
  0xa0   :  { %v285_v42 = vpop.eup %284  ;;  %235 = vst [vmem:[#allocation2 + $0x20] sm:$0xff] %v219_v37  ;;  %v203_v43 = vmul.f32 1.442695, %v174_v38  ;;  %v154_v44 = vmul.f32 %v138_v39, %v138_v39 }
  0xa1   :  { %v287_v45 = vpop.eup %286  ;;  %v222_v46 = vmul.f32 %v285_v42, %v432_v57  ;;  %v201_v47 = vmul.f32 1.442695, %v173_v40  ;;  %v153_v48 = vmul.f32 %v137_v41, %v137_v41 }
  0xa2   :  { %v221_v49 = vmul.f32 %v287_v45, %v432_v57  ;;  %296 = vpow2.f32 %v203_v43  ;;  %v176_v50 = vmul.f32 %v415_v22, %v154_v44 }
  0xa3   :  { %238 = vst [vmem:[#allocation2 + $0x38] sm:$0xff] %v222_v46  ;;  %298 = vpow2.f32 %v201_v47  ;;  %v175_v51 = vmul.f32 %v415_v22, %v153_v48 }
  0xa4   :  { %v289_v52 = vpop.eup %288  ;;  %237 = vst [vmem:[#allocation2 + $0x30] sm:$0xff] %v221_v49  ;;  %v207_v17 = vmul.f32 1.442695, %v176_v50 }
  0xa5   :  { %v291_v53 = vpop.eup %290  ;;  %v224_v54 = vmul.f32 %v289_v52, %v432_v57  ;;  %v205_v55 = vmul.f32 1.442695, %v175_v51 }
  0xa6   :  { %v223_v56 = vmul.f32 %v291_v53, %v432_v57  ;;  %300 = vpow2.f32 %v207_v17 }
  0xa7   :  { %240 = vst [vmem:[#allocation2 + $0x48] sm:$0xff] %v224_v54  ;;  %302 = vpow2.f32 %v205_v55 }
  0xa8   :  { %v293_v58 = vpop.eup %292  ;;  %239 = vst [vmem:[#allocation2 + $0x40] sm:$0xff] %v223_v56 }
  0xa9   :  { %v295_v59 = vpop.eup %294  ;;  %v226_v60 = vmul.f32 %v293_v58, %v432_v57 }
  0xaa   :  { %v225_v61 = vmul.f32 %v295_v59, %v432_v57 }
  0xab   :  { %242 = vst [vmem:[#allocation2 + $0x58] sm:$0xff] %v226_v60 }
  0xac   :  { %v297_v22 = vpop.eup %296  ;;  %241 = vst [vmem:[#allocation2 + $0x50] sm:$0xff] %v225_v61 }
  0xad   :  { %v299_v62 = vpop.eup %298  ;;  %v228_v63 = vmul.f32 %v297_v22, %v432_v57 }
  0xae   :  { %v227_v0 = vmul.f32 %v299_v62, %v432_v57 }
  0xaf   :  { %244 = vst [vmem:[#allocation2 + $0x68] sm:$0xff] %v228_v63 }
  0xb0   :  { %v301_v1 = vpop.eup %300  ;;  %243 = vst [vmem:[#allocation2 + $0x60] sm:$0xff] %v227_v0 }
  0xb1   :  { %v303_v2 = vpop.eup %302  ;;  %v230_v3 = vmul.f32 %v301_v1, %v432_v57 }
  0xb2   :  { %v229_v4 = vmul.f32 %v303_v2, %v432_v57 }
  0xb3   :  { %246 = vst [vmem:[#allocation2 + $0x78] sm:$0xff] %v230_v3 }
  0xb4   :  { %245 = vst [vmem:[#allocation2 + $0x70] sm:$0xff] %v229_v4 }
  0xb5   :  { %315 = shalt.err (!%p312_p4)
}
  0xb6   :  { %s316_s28 = scalar_lea.hbm %s484_s4, 2048 }
  0xb7   :  { %p317_p5 = scmp.ne.s32.totalorder %s484_s4, %s316_s28  ;;  %p320_p6 = scmp.lt.u32.totalorder %s316_s28, %s484_s4 }
  0xb9   :  { %p322_p7 = pnand %p320_p6, %p317_p5 }
  0xbb   :  { %325 = shalt.err (!%p322_p7)
}
  0xbc   :  { %s330_s7 = smov 128   ;;  %s331_s8 = smov 8  }
  0xbd   :  { %258 = dma.vmem_to_hbm [thread:$0]  %s253_s3, 2048, %s484_s4, [#allocation3], %s330_s7, %s330_s7, %s331_s8  }
  0xbe   :  { %326 = dma.done.wait [#allocation3], 2048  }
  0xbf   :  { %327 = vsyncadd [#allocation3], 4294965248 }
  0xc0   :  { %262 = vsyncpa [#allocation3], 1 }

</bundles_post_ra>
